<compile_context>
chip_gen: v6e
topology: v6e:2x2x1
jax: 0.10.0
libtpu: 0.0.40
codegen_flags: <defaults>
</compile_context>

<pallas_src>
import math

import jax
import jax.numpy as jnp
from jax.experimental import pallas as pl
from jax.experimental.pallas import tpu as pltpu


HIDDEN = 256
OUT_LANES = 128        # lane-dense packed layer-3 weight (fc3 -> lane 0, fc6 -> lane 1)
MAX_TILE_B = 512       # batch tile; fits comfortably in default scoped VMEM on all gens


def _round_up(x, m):
    return ((x + m - 1) // m) * m


def _critic_kernel(state_ref, action_ref,
                   ws_ref, wa_ref, b14_ref,
                   w2_ref, b2_ref, w5_ref, b5_ref,
                   w36_ref, b36_ref,
                   out_ref):
    """One batch tile: fused twin-Q forward.

    bf16 MXU operands, f32 accumulation, f32 bias + tanh, narrow [tile_b, 2] store.
    """
    s = state_ref[...].astype(jnp.bfloat16)   # [TILE_B, input_dim]
    a = action_ref[...].astype(jnp.bfloat16)  # [TILE_B, action_dim]

    # ---- fused layer 1 (fc1 | fc4): one 512-wide activation, no sa concat ----
    h = jnp.tanh(
        jnp.dot(s, ws_ref[...], preferred_element_type=jnp.float32)
        + jnp.dot(a, wa_ref[...], preferred_element_type=jnp.float32)
        + b14_ref[...])                                  # f32 [TILE_B, 512]
    hb = h.astype(jnp.bfloat16)

    # ---- layer 2 (fc2 / fc5) --------------------------------------------------
    g1 = jnp.tanh(jnp.dot(hb[:, :HIDDEN], w2_ref[...],
                          preferred_element_type=jnp.float32) + b2_ref[...])
    g2 = jnp.tanh(jnp.dot(hb[:, HIDDEN:], w5_ref[...],
                          preferred_element_type=jnp.float32) + b5_ref[...])

    # ---- layer 3 (fc3 | fc6) as ONE MXU push ----------------------------------
    # w36 has fc3's column in lane 0 (rows 0..255) and fc6's column in lane 1
    # (rows 256..511); the lane concat of g1/g2 is layout-only (128-multiple offsets).
    g12 = jnp.concatenate([g1, g2], axis=1).astype(jnp.bfloat16)     # [TILE_B, 512]
    q = jnp.dot(g12, w36_ref[...], preferred_element_type=jnp.float32)  # [TILE_B, 128]
    out_ref[...] = q[:, :2] + b36_ref[...]               # narrow 8-B/row writeback


def pack_critic_params(params, input_dim):
    """Fuse / pad / bf16-cast weights ONCE per parameter update (not per forward)."""
    w1, w4 = params["w1"], params["w4"]                               # [d_in, 256] each
    ws = jnp.concatenate([w1[:input_dim], w4[:input_dim]], axis=1)    # [in, 512]
    wa = jnp.concatenate([w1[input_dim:], w4[input_dim:]], axis=1)    # [act, 512]
    b14 = jnp.concatenate([params["b1"], params["b4"]], axis=1)       # [1, 512]

    w36 = jnp.zeros((2 * HIDDEN, OUT_LANES), jnp.float32)
    w36 = (w36.at[:HIDDEN, 0:1].set(params["w3"])
               .at[HIDDEN:, 1:2].set(params["w6"]))                   # [512, 128]
    b36 = jnp.concatenate([params["b3"], params["b6"]], axis=1)       # [1, 2]

    bf16 = jnp.bfloat16
    return dict(
        ws=ws.astype(bf16), wa=wa.astype(bf16), b14=b14.astype(jnp.float32),
        w2=params["w2"].astype(bf16), b2=params["b2"].astype(jnp.float32),
        w5=params["w5"].astype(bf16), b5=params["b5"].astype(jnp.float32),
        w36=w36.astype(bf16), b36=b36.astype(jnp.float32))


def critic_forward(state, action, packed):
    """state: [B, input_dim], action: [B, action_dim] -> (q1 [B,1], q2 [B,1])."""
    state = state.astype(jnp.float32)
    action = action.astype(jnp.float32)
    B, input_dim = state.shape
    action_dim = action.shape[1]
    d_in = input_dim + action_dim

    # --- batch tiling ----------------------------------------------------------
    # Cap the tile at ceil(B/2) rows so the grid has >= 2 programs whenever
    # possible (lets "parallel" shard the batch across both TCs on v7x).
    tile_b = min(MAX_TILE_B, max(8, _round_up(-(-B // 2), 8)))
    b_pad = _round_up(B, tile_b)
    if b_pad != B:
        state = jnp.pad(state, ((0, b_pad - B), (0, 0)))
        action = jnp.pad(action, ((0, b_pad - B), (0, 0)))
    grid = (b_pad // tile_b,)

    const = lambda i: (0, 0)       # weights stay VMEM-resident across the grid
    row = lambda i: (i, 0)

    in_specs = [
        pl.BlockSpec((tile_b, input_dim), row),
        pl.BlockSpec((tile_b, action_dim), row),
        pl.BlockSpec((input_dim, 2 * HIDDEN), const),
        pl.BlockSpec((action_dim, 2 * HIDDEN), const),
        pl.BlockSpec((1, 2 * HIDDEN), const),
        pl.BlockSpec((HIDDEN, HIDDEN), const),
        pl.BlockSpec((1, HIDDEN), const),
        pl.BlockSpec((HIDDEN, HIDDEN), const),
        pl.BlockSpec((1, HIDDEN), const),
        pl.BlockSpec((2 * HIDDEN, OUT_LANES), const),
        pl.BlockSpec((1, 2), const),
    ]
    out_specs = pl.BlockSpec((tile_b, 2), row)

    weight_bytes = sum(int(v.size) * v.dtype.itemsize for v in packed.values())
    cost = pl.CostEstimate(
        flops=2 * b_pad * (d_in * 2 * HIDDEN
                           + 2 * HIDDEN * HIDDEN
                           + 2 * HIDDEN * OUT_LANES),
        transcendentals=b_pad * 4 * HIDDEN,
        bytes_accessed=4 * b_pad * (d_in + 2) + weight_bytes,
    )

    out = pl.pallas_call(
        _critic_kernel,
        out_shape=jax.ShapeDtypeStruct((b_pad, 2), jnp.float32),
        grid=grid,
        in_specs=in_specs,
        out_specs=out_specs,
        compiler_params=pltpu.CompilerParams(
            dimension_semantics=("parallel",)),
        cost_estimate=cost,
    )(state, action,
      packed["ws"], packed["wa"], packed["b14"],
      packed["w2"], packed["b2"], packed["w5"], packed["b5"],
      packed["w36"], packed["b36"])

    return out[:B, 0:1], out[:B, 1:2]


def init_critic_params(key, input_dim, action_dim):
    """Deterministic init mimicking torch.nn.Linear default U(-1/sqrt(fan_in), +)."""
    d_in = input_dim + action_dim

    def linear(k, fan_in, fan_out):
        k_w, k_b = jax.random.split(k)
        bound = 1.0 / math.sqrt(fan_in)
        # stored as [in, out] so the computation is x @ W
        w = jax.random.uniform(k_w, (fan_in, fan_out), jnp.float32, -bound, bound)
        b = jax.random.uniform(k_b, (1, fan_out), jnp.float32, -bound, bound)
        return w, b

    keys = jax.random.split(key, 6)
    w1, b1 = linear(keys[0], d_in, HIDDEN)
    w2, b2 = linear(keys[1], HIDDEN, HIDDEN)
    w3, b3 = linear(keys[2], HIDDEN, 1)
    w4, b4 = linear(keys[3], d_in, HIDDEN)
    w5, b5 = linear(keys[4], HIDDEN, HIDDEN)
    w6, b6 = linear(keys[5], HIDDEN, 1)
    return dict(w1=w1, b1=b1, w2=w2, b2=b2, w3=w3, b3=b3,
                w4=w4, b4=b4, w5=w5, b5=b5, w6=w6, b6=b6)


def critic_reference(state, action, params):
    """Pure-JAX f32 reference (matches the PyTorch module exactly)."""
    sa = jnp.concatenate([state, action], axis=1).astype(jnp.float32)
    h = jnp.tanh(sa @ params["w1"] + params["b1"])
    h = jnp.tanh(h @ params["w2"] + params["b2"])
    q1 = h @ params["w3"] + params["b3"]
    g = jnp.tanh(sa @ params["w4"] + params["b4"])
    g = jnp.tanh(g @ params["w5"] + params["b5"])
    q2 = g @ params["w6"] + params["b6"]
    return q1, q2


def critic_reference_bf16(state, action, packed):
    """Pure-JAX reference with the SAME bf16-operand / f32-accumulate math as the kernel."""
    s = state.astype(jnp.bfloat16)
    a = action.astype(jnp.bfloat16)
    h = jnp.tanh(jnp.dot(s, packed["ws"], preferred_element_type=jnp.float32)
                 + jnp.dot(a, packed["wa"], preferred_element_type=jnp.float32)
                 + packed["b14"])
    hb = h.astype(jnp.bfloat16)
    g1 = jnp.tanh(jnp.dot(hb[:, :HIDDEN], packed["w2"],
                          preferred_element_type=jnp.float32) + packed["b2"])
    g2 = jnp.tanh(jnp.dot(hb[:, HIDDEN:], packed["w5"],
                          preferred_element_type=jnp.float32) + packed["b5"])
    g12 = jnp.concatenate([g1, g2], axis=1).astype(jnp.bfloat16)
    out = jnp.dot(g12, packed["w36"], preferred_element_type=jnp.float32)[:, :2] + packed["b36"]
    return out[:, 0:1], out[:, 1:2]


if __name__ == "__main__":
    # LunarLander: observation dim 8; TD3 implies continuous actions (dim 2).
    input_dim, action_dim = 8, 2
    batch = 4

    key = jax.random.PRNGKey(0)
    k_state, k_action, k_params = jax.random.split(key, 3)

    state = jax.random.normal(k_state, (batch, input_dim), jnp.float32)
    action = jax.random.uniform(k_action, (batch, action_dim), jnp.float32,
                                -1.0, 1.0)
    params = init_critic_params(k_params, input_dim, action_dim)

    packed = pack_critic_params(params, input_dim)   # once per parameter update
    fwd = jax.jit(critic_forward)

    q1, q2 = fwd(state, action, packed)
    q1, q2 = jax.block_until_ready((q1, q2))
    assert q1.shape == (batch, 1) and q2.shape == (batch, 1)

    # Exact-math check against a reference using the same bf16-operand path.
    q1_b, q2_b = critic_reference_bf16(state, action, packed)
    assert jnp.allclose(q1, q1_b, atol=1e-3, rtol=1e-3)
    assert jnp.allclose(q2, q2_b, atol=1e-3, rtol=1e-3)

    # Module-semantics check against the pure-f32 PyTorch-equivalent reference
    # (loose tolerance: bf16 matmul operands introduce ~1e-3-level error).
    q1_ref, q2_ref = critic_reference(state, action, params)
    assert jnp.allclose(q1, q1_ref, atol=3e-2, rtol=3e-2)
    assert jnp.allclose(q2, q2_ref, atol=3e-2, rtol=3e-2)

    print("KERNEL_OK")
</pallas_src>

<mosaic_0001>
module attributes {stable_mosaic.version = 11 : i64} {
  func.func @_critic_kernel(%arg0: i32, %arg1: memref<8x8xf32, #tpu.memory_space<vmem>>, %arg2: memref<8x2xf32, #tpu.memory_space<vmem>>, %arg3: memref<8x512xbf16, #tpu.memory_space<vmem>>, %arg4: memref<2x512xbf16, #tpu.memory_space<vmem>>, %arg5: memref<1x512xf32, #tpu.memory_space<vmem>>, %arg6: memref<256x256xbf16, #tpu.memory_space<vmem>>, %arg7: memref<1x256xf32, #tpu.memory_space<vmem>>, %arg8: memref<256x256xbf16, #tpu.memory_space<vmem>>, %arg9: memref<1x256xf32, #tpu.memory_space<vmem>>, %arg10: memref<512x128xbf16, #tpu.memory_space<vmem>>, %arg11: memref<1x2xf32, #tpu.memory_space<vmem>>, %arg12: memref<8x2xf32, #tpu.memory_space<vmem>>) attributes {dimension_semantics = [#tpu.dimension_semantics<parallel>], iteration_bounds = array<i64: 1>, scalar_prefetch = 0 : i64, scratch_operands = 0 : i64, tpu.core_type = #tpu.core_type<tc>, window_params = [{transform_indices = @transform_0, window_bounds = array<i64: 8, 8>}, {transform_indices = @transform_1, window_bounds = array<i64: 8, 2>}, {pipeline_mode = #tpu.pipeline_mode<synchronous>, transform_indices = @transform_2, window_bounds = array<i64: 8, 512>}, {pipeline_mode = #tpu.pipeline_mode<synchronous>, transform_indices = @transform_3, window_bounds = array<i64: 2, 512>}, {pipeline_mode = #tpu.pipeline_mode<synchronous>, transform_indices = @transform_4, window_bounds = array<i64: 1, 512>}, {pipeline_mode = #tpu.pipeline_mode<synchronous>, transform_indices = @transform_5, window_bounds = array<i64: 256, 256>}, {pipeline_mode = #tpu.pipeline_mode<synchronous>, transform_indices = @transform_6, window_bounds = array<i64: 1, 256>}, {pipeline_mode = #tpu.pipeline_mode<synchronous>, transform_indices = @transform_7, window_bounds = array<i64: 256, 256>}, {pipeline_mode = #tpu.pipeline_mode<synchronous>, transform_indices = @transform_8, window_bounds = array<i64: 1, 256>}, {pipeline_mode = #tpu.pipeline_mode<synchronous>, transform_indices = @transform_9, window_bounds = array<i64: 512, 128>}, {pipeline_mode = #tpu.pipeline_mode<synchronous>, transform_indices = @transform_10, window_bounds = array<i64: 1, 2>}, {transform_indices = @transform_11, window_bounds = array<i64: 8, 2>}]} {
    %c0 = arith.constant 0 : index
    %c0_0 = arith.constant 0 : index
    %0 = vector.load %arg1[%c0, %c0_0] : memref<8x8xf32, #tpu.memory_space<vmem>>, vector<8x8xf32>
    %1 = arith.truncf %0 : vector<8x8xf32> to vector<8x8xbf16>
    %c0_1 = arith.constant 0 : index
    %c0_2 = arith.constant 0 : index
    %2 = vector.load %arg2[%c0_1, %c0_2] : memref<8x2xf32, #tpu.memory_space<vmem>>, vector<8x2xf32>
    %3 = arith.truncf %2 : vector<8x2xf32> to vector<8x2xbf16>
    %c0_3 = arith.constant 0 : index
    %c0_4 = arith.constant 0 : index
    %4 = vector.load %arg3[%c0_3, %c0_4] : memref<8x512xbf16, #tpu.memory_space<vmem>>, vector<8x512xbf16>
    %cst = arith.constant dense<0.000000e+00> : vector<8x512xf32>
    %5 = tpu.matmul %1, %4, %cst {dimension_numbers = #tpu.dot_dimension_numbers<[1], [0], [0], [1], [0, 0, 1, 1], [], []>} : vector<8x8xbf16>, vector<8x512xbf16>, vector<8x512xf32> -> vector<8x512xf32>
    %c0_5 = arith.constant 0 : index
    %c0_6 = arith.constant 0 : index
    %6 = vector.load %arg4[%c0_5, %c0_6] : memref<2x512xbf16, #tpu.memory_space<vmem>>, vector<2x512xbf16>
    %cst_7 = arith.constant dense<0.000000e+00> : vector<8x512xf32>
    %7 = tpu.matmul %3, %6, %cst_7 {dimension_numbers = #tpu.dot_dimension_numbers<[1], [0], [0], [1], [0, 0, 1, 1], [], []>} : vector<8x2xbf16>, vector<2x512xbf16>, vector<8x512xf32> -> vector<8x512xf32>
    %8 = arith.addf %5, %7 : vector<8x512xf32>
    %c0_8 = arith.constant 0 : index
    %c0_9 = arith.constant 0 : index
    %9 = vector.load %arg5[%c0_8, %c0_9] : memref<1x512xf32, #tpu.memory_space<vmem>>, vector<1x512xf32>
    %10 = vector.broadcast %9 : vector<1x512xf32> to vector<8x512xf32>
    %11 = arith.addf %8, %10 : vector<8x512xf32>
    %12 = math.tanh %11 : vector<8x512xf32>
    %13 = arith.truncf %12 : vector<8x512xf32> to vector<8x512xbf16>
    %14 = vector.extract_strided_slice %13 {offsets = [0, 0], sizes = [8, 256], strides = [1, 1]} : vector<8x512xbf16> to vector<8x256xbf16>
    %c0_10 = arith.constant 0 : index
    %c0_11 = arith.constant 0 : index
    %15 = vector.load %arg6[%c0_10, %c0_11] : memref<256x256xbf16, #tpu.memory_space<vmem>>, vector<256x256xbf16>
    %cst_12 = arith.constant dense<0.000000e+00> : vector<8x256xf32>
    %16 = tpu.matmul %14, %15, %cst_12 {dimension_numbers = #tpu.dot_dimension_numbers<[1], [0], [0], [1], [0, 0, 1, 1], [], []>} : vector<8x256xbf16>, vector<256x256xbf16>, vector<8x256xf32> -> vector<8x256xf32>
    %c0_13 = arith.constant 0 : index
    %c0_14 = arith.constant 0 : index
    %17 = vector.load %arg7[%c0_13, %c0_14] : memref<1x256xf32, #tpu.memory_space<vmem>>, vector<1x256xf32>
    %18 = vector.broadcast %17 : vector<1x256xf32> to vector<8x256xf32>
    %19 = arith.addf %16, %18 : vector<8x256xf32>
    %20 = math.tanh %19 : vector<8x256xf32>
    %21 = vector.extract_strided_slice %13 {offsets = [0, 256], sizes = [8, 256], strides = [1, 1]} : vector<8x512xbf16> to vector<8x256xbf16>
    %c0_15 = arith.constant 0 : index
    %c0_16 = arith.constant 0 : index
    %22 = vector.load %arg8[%c0_15, %c0_16] : memref<256x256xbf16, #tpu.memory_space<vmem>>, vector<256x256xbf16>
    %cst_17 = arith.constant dense<0.000000e+00> : vector<8x256xf32>
    %23 = tpu.matmul %21, %22, %cst_17 {dimension_numbers = #tpu.dot_dimension_numbers<[1], [0], [0], [1], [0, 0, 1, 1], [], []>} : vector<8x256xbf16>, vector<256x256xbf16>, vector<8x256xf32> -> vector<8x256xf32>
    %c0_18 = arith.constant 0 : index
    %c0_19 = arith.constant 0 : index
    %24 = vector.load %arg9[%c0_18, %c0_19] : memref<1x256xf32, #tpu.memory_space<vmem>>, vector<1x256xf32>
    %25 = vector.broadcast %24 : vector<1x256xf32> to vector<8x256xf32>
    %26 = arith.addf %23, %25 : vector<8x256xf32>
    %27 = math.tanh %26 : vector<8x256xf32>
    %28 = tpu.concatenate %20, %27 in 1 : vector<8x256xf32>, vector<8x256xf32> -> vector<8x512xf32>
    %29 = arith.truncf %28 : vector<8x512xf32> to vector<8x512xbf16>
    %c0_20 = arith.constant 0 : index
    %c0_21 = arith.constant 0 : index
    %30 = vector.load %arg10[%c0_20, %c0_21] : memref<512x128xbf16, #tpu.memory_space<vmem>>, vector<512x128xbf16>
    %cst_22 = arith.constant dense<0.000000e+00> : vector<8x128xf32>
    %31 = tpu.matmul %29, %30, %cst_22 {dimension_numbers = #tpu.dot_dimension_numbers<[1], [0], [0], [1], [0, 0, 1, 1], [], []>} : vector<8x512xbf16>, vector<512x128xbf16>, vector<8x128xf32> -> vector<8x128xf32>
    %32 = vector.extract_strided_slice %31 {offsets = [0, 0], sizes = [8, 2], strides = [1, 1]} : vector<8x128xf32> to vector<8x2xf32>
    %c0_23 = arith.constant 0 : index
    %c0_24 = arith.constant 0 : index
    %33 = vector.load %arg11[%c0_23, %c0_24] : memref<1x2xf32, #tpu.memory_space<vmem>>, vector<1x2xf32>
    %34 = vector.broadcast %33 : vector<1x2xf32> to vector<8x2xf32>
    %35 = arith.addf %32, %34 : vector<8x2xf32>
    %c0_25 = arith.constant 0 : index
    %c0_26 = arith.constant 0 : index
    %36 = vector.load %arg12[%c0_25, %c0_26] : memref<8x2xf32, #tpu.memory_space<vmem>>, vector<8x2xf32>
    tpu.vector_store %arg12[%c0_25, %c0_26], %35 {strides = array<i32>} : memref<8x2xf32, #tpu.memory_space<vmem>>, vector<8x2xf32>,
    return
  }
  func.func @transform_0(%arg0: i32) -> (i32, i32) {
    %c0_i32 = arith.constant 0 : i32
    %c0_i32_0 = arith.constant 0 : i32
    return %arg0, %c0_i32 : i32, i32
  }
  func.func @transform_1(%arg0: i32) -> (i32, i32) {
    %c0_i32 = arith.constant 0 : i32
    %c0_i32_0 = arith.constant 0 : i32
    return %arg0, %c0_i32 : i32, i32
  }
  func.func @transform_2(%arg0: i32) -> (i32, i32) {
    %c0_i32 = arith.constant 0 : i32
    %c0_i32_0 = arith.constant 0 : i32
    %c0_i32_1 = arith.constant 0 : i32
    return %c0_i32, %c0_i32_0 : i32, i32
  }
  func.func @transform_3(%arg0: i32) -> (i32, i32) {
    %c0_i32 = arith.constant 0 : i32
    %c0_i32_0 = arith.constant 0 : i32
    %c0_i32_1 = arith.constant 0 : i32
    return %c0_i32, %c0_i32_0 : i32, i32
  }
  func.func @transform_4(%arg0: i32) -> (i32, i32) {
    %c0_i32 = arith.constant 0 : i32
    %c0_i32_0 = arith.constant 0 : i32
    %c0_i32_1 = arith.constant 0 : i32
    return %c0_i32, %c0_i32_0 : i32, i32
  }
  func.func @transform_5(%arg0: i32) -> (i32, i32) {
    %c0_i32 = arith.constant 0 : i32
    %c0_i32_0 = arith.constant 0 : i32
    %c0_i32_1 = arith.constant 0 : i32
    return %c0_i32, %c0_i32_0 : i32, i32
  }
  func.func @transform_6(%arg0: i32) -> (i32, i32) {
    %c0_i32 = arith.constant 0 : i32
    %c0_i32_0 = arith.constant 0 : i32
    %c0_i32_1 = arith.constant 0 : i32
    return %c0_i32, %c0_i32_0 : i32, i32
  }
  func.func @transform_7(%arg0: i32) -> (i32, i32) {
    %c0_i32 = arith.constant 0 : i32
    %c0_i32_0 = arith.constant 0 : i32
    %c0_i32_1 = arith.constant 0 : i32
    return %c0_i32, %c0_i32_0 : i32, i32
  }
  func.func @transform_8(%arg0: i32) -> (i32, i32) {
    %c0_i32 = arith.constant 0 : i32
    %c0_i32_0 = arith.constant 0 : i32
    %c0_i32_1 = arith.constant 0 : i32
    return %c0_i32, %c0_i32_0 : i32, i32
  }
  func.func @transform_9(%arg0: i32) -> (i32, i32) {
    %c0_i32 = arith.constant 0 : i32
    %c0_i32_0 = arith.constant 0 : i32
    %c0_i32_1 = arith.constant 0 : i32
    return %c0_i32, %c0_i32_0 : i32, i32
  }
  func.func @transform_10(%arg0: i32) -> (i32, i32) {
    %c0_i32 = arith.constant 0 : i32
    %c0_i32_0 = arith.constant 0 : i32
    %c0_i32_1 = arith.constant 0 : i32
    return %c0_i32, %c0_i32_0 : i32, i32
  }
  func.func @transform_11(%arg0: i32) -> (i32, i32) {
    %c0_i32 = arith.constant 0 : i32
    %c0_i32_0 = arith.constant 0 : i32
    return %arg0, %c0_i32 : i32, i32
  }
}

</mosaic_0001>

<bundles_post_ra>
// kernel: critic_forward.1
= control target key start
LH: loop header
LB: loop body
LE: loop exit
PB: predicated region body
PF: predicated region fallthrough
CT: control target
= control target key end

     0   :  { %16 = vsyncpa [#allocation3], 0  ;;  %s1710_s0 = inlined_call_operand.vmem [shape: f32[8,8], index: 0, kind: input, shape index: {}]   ;;  %s1711_s1 = inlined_call_operand.vmem [shape: f32[8,2], index: 1, kind: input, shape index: {}]   ;;  %s1712_s2 = inlined_call_operand.vmem [shape: bf16[8,512], index: 2, kind: input, shape index: {}]   ;;  %s1713_s3 = inlined_call_operand.vmem [shape: bf16[2,512], index: 3, kind: input, shape index: {}]   ;;  %s1714_s4 = inlined_call_operand.vmem [shape: f32[1,512], index: 4, kind: input, shape index: {}]   ;;  %s1715_s5 = inlined_call_operand.hbm [shape: bf16[256,256], index: 5, kind: input, shape index: {}]   ;;  %s1716_s6 = inlined_call_operand.vmem [shape: f32[1,256], index: 6, kind: input, shape index: {}]   ;;  %s1717_s7 = inlined_call_operand.hbm [shape: bf16[256,256], index: 7, kind: input, shape index: {}]   ;;  %s1718_s8 = inlined_call_operand.vmem [shape: f32[1,256], index: 8, kind: input, shape index: {}]   ;;  %s1719_s9 = inlined_call_operand.hbm [shape: bf16[512,128], index: 9, kind: input, shape index: {}]   ;;  %s1720_s10 = inlined_call_operand.vmem [shape: f32[1,2], index: 10, kind: input, shape index: {}]   ;;  %s1721_s11 = inlined_call_operand.vmem [shape: f32[8,2], index: 11, kind: output, shape index: {}]  }
   0x1   :  { %17 = vsyncpa [#allocation5], 0  ;;  %s1578_s17 = smov [#allocation4]   ;;  %s1579_s19 = smov [#allocation2]  }
   0x2   :  { %s47_s18 = sshll.u32 %s1578_s17, 4  ;;  %s33_s20 = sshll.u32 %s1579_s19, 4  ;;  %s48_s18 = int_to_ptr.vmem [resolvable:$true] %s47_s18  ;;  %s34_s20 = int_to_ptr.vmem [resolvable:$true] %s33_s20 }
   0x3   :  { %s1522_s21 = scalar_lea.vmem %s48_s18, 4096  ;;  %p1527_p1 = scmp.lt.s32.totalorder %s48_s18, %s48_s18 }
   0x4   :  { %p1523_p0 = scmp.ne.s32.totalorder %s48_s18, %s1522_s21  ;;  %p1528_p2 = scmp.lt.s32.totalorder %s1522_s21, %s1522_s21 }
   0x6   :  { %p1529_p3 = por %p1528_p2, %p1527_p1 }
   0x8   :  { %p1530_p4 = pnand %p1529_p3, %p1523_p0 }
   0xa   :  { %1533 = shalt.err (!%p1530_p4)
}
   0xb   :  { %s1580_s22 = smov 128   ;;  %s1581_s23 = smov 8  }
   0xc   :  { %53 = dma.hbm_to_vmem [thread:$0]  %s1717_s7, 4096, %s48_s18, [#allocation5], %s1580_s22, %s1580_s22, %s1581_s23  }
   0xd   :  { %s1542_s26 = scalar_lea.vmem %s34_s20, 4096  ;;  %p1547_p6 = scmp.lt.s32.totalorder %s34_s20, %s34_s20 }
   0xe   :  { %p1543_p5 = scmp.ne.s32.totalorder %s34_s20, %s1542_s26  ;;  %p1548_p7 = scmp.lt.s32.totalorder %s1542_s26, %s1542_s26 }
  0x10   :  { %p1549_p8 = por %p1548_p7, %p1547_p6 }
  0x12   :  { %p1550_p9 = pnand %p1549_p8, %p1543_p5 }
  0x14   :  { %1553 = shalt.err (!%p1550_p9)
}
  0x15   :  { %39 = dma.hbm_to_vmem [thread:$0]  %s1715_s5, 4096, %s34_s20, [#allocation3], %s1580_s22, %s1580_s22, %s1581_s23  }
  0x16   :  { %s1582_s29 = smov [#allocation6]  }
  0x17   :  { %s61_s30 = sshll.u32 %s1582_s29, 4  ;;  %s62_s30 = int_to_ptr.vmem [resolvable:$true] %s61_s30 }
  0x18   :  { %s1562_s12 = scalar_lea.vmem %s62_s30, 4096  ;;  %p1567_p11 = scmp.lt.s32.totalorder %s62_s30, %s62_s30 }
  0x19   :  { %p1563_p10 = scmp.ne.s32.totalorder %s62_s30, %s1562_s12  ;;  %p1568_p12 = scmp.lt.s32.totalorder %s1562_s12, %s1562_s12 }
  0x1b   :  { %p1569_p13 = por %p1568_p12, %p1567_p11 }
  0x1d   :  { %p1570_p0 = pnand %p1569_p13, %p1563_p10 }
  0x1f   :  { %1573 = shalt.err (!%p1570_p0)
}
  0x20   :  { %s1583_s7 = smov 64   ;;  %s1584_s13 = smov 4  }
  0x21   :  { %67 = dma.hbm_to_vmem [thread:$0]  %s1719_s9, 4096, %s62_s30, [#allocation5], %s1583_s7, %s1583_s7, %s1584_s13  }
  0x22   :  { %1574 = dma.done.wait [#allocation3], 4096  }
  0x23   :  { %1575 = vsyncadd [#allocation3], 4294963200 }
  0x24   :  { %1576 = dma.done.wait [#allocation5], 8192  }
  0x25   :  { %1577 = vsyncadd [#allocation5], 4294959104  ;;  %v99_v0 = vlaneseq  ;;  %v1585_v1 = vmov 1966171168   ;;  %v1586_v3 = vmov 0   ;;  %vm116_vm0 = vcmask 1040384  }
  0x26   :  { %v97_v2 = vunpack.c.l.s4 %v1585_v1  ;;  %161 = vmatprep.mubr.bf16.mxu0 %v1586_v3  ;;  %202 = vmatprep.mubr.bf16.mxu1 %v1586_v3  ;;  %v1203_v7 = vld.sshfl [vmem:[%s1713_s3] sm:$0x33 pattern:$0x75316420]  ;;  %v85_v13 = vld [vmem:[%s1712_s2 + $0x8] sm:$0xff]  ;;  %vm225_vm1 = vcmask 1043456  }
  0x27   :  { %v1656_v4 = vshrl.u32 %v99_v0, 7  ;;  %v84_v8 = vld [vmem:[%s1712_s2] sm:$0xff]  ;;  %v95_v9 = vcombine.high %v1203_v7, %v1203_v7  ;;  %v1211_v21 = vcombine.high %v85_v13, %v85_v13  ;;  %v1210_v22 = vcombine.low %v85_v13, %v85_v13  ;;  %v1372_v24 = vld [vmem:[#allocation2 + $0x74] ss:$8 sps:$4 sm:$0xff]   ;;  %v1370_v29 = vld [vmem:[#allocation2 + $0x70] ss:$8 sps:$4 sm:$0xff]  }
  0x28   :  { %v98_v5 = vunpack.c.0.s8 %v97_v2  ;;  %v82_v11 = vld [vmem:[%s1711_s1] sm:$0xff]  ;;  %v1209_v12 = vcombine.high %v84_v8, %v84_v8  ;;  %v1208_v17 = vcombine.low %v84_v8, %v84_v8  ;;  %vm112_vm2 = vcmask 15360   ;;  %v1375_v26 = vld [vmem:[#allocation4 + $0x74] ss:$8 sps:$4 sm:$0xff]   ;;  %v1373_v31 = vld [vmem:[#allocation4 + $0x70] ss:$8 sps:$4 sm:$0xff]  }
  0x29   :  { %v83_v18 = vpack.c.bf16 %v82_v11, %v82_v11  ;;  %v233_v25 = vsel %vm225_vm1, %v1210_v22, 0  ;;  %v80_v27 = vld [vmem:[%s1710_s0] sm:$0xff]  ;;  %vm221_vm3 = vcmask 64512   ;;  %v1384_v34 = vld [vmem:[#allocation2 + $0x54] ss:$8 sps:$4 sm:$0xff]  }
  0x2a   :  { %v101_v6 = vsub.s32 %v98_v5, %v1656_v4  ;;  %v227_v23 = vsel %vm225_vm1, %v1208_v17, 0  ;;  %v81_v28 = vpack.c.bf16 %v80_v27, %v80_v27  ;;  %v1378_v30 = vld [vmem:[#allocation2 + $0x64] ss:$8 sps:$4 sm:$0xff]   ;;  %v1376_v33 = vld [vmem:[#allocation2 + $0x60] ss:$8 sps:$4 sm:$0xff]  }
  0x2b   :  { %v1381_v32 = vld [vmem:[#allocation4 + $0x64] ss:$8 sps:$4 sm:$0xff]   ;;  %v1379_v35 = vld [vmem:[#allocation4 + $0x60] ss:$8 sps:$4 sm:$0xff]   ;;  %v1382_v36 = vld [vmem:[#allocation2 + $0x50] ss:$8 sps:$4 sm:$0xff]  }
  0x2c   :  { %v102_v10 = vrot.slane %v1203_v7, %v101_v6  ;;  %v109_v14 = vrot.slane %v95_v9, %v101_v6  ;;  %v1387_v37 = vld [vmem:[#allocation4 + $0x54] ss:$8 sps:$4 sm:$0xff]   ;;  %v1385_v38 = vld [vmem:[#allocation4 + $0x50] ss:$8 sps:$4 sm:$0xff]   ;;  %v1390_v39 = vld [vmem:[#allocation2 + $0x44] ss:$8 sps:$4 sm:$0xff]  }
  0x2d   :  { %v1393_v40 = vld [vmem:[#allocation4 + $0x44] ss:$8 sps:$4 sm:$0xff]   ;;  %v1388_v41 = vld [vmem:[#allocation2 + $0x40] ss:$8 sps:$4 sm:$0xff]   ;;  %v1396_v42 = vld [vmem:[#allocation2 + $0x34] ss:$8 sps:$4 sm:$0xff]  }
  0x2e   :  { %v118_v15 = vsel %vm116_vm0, %v102_v10, 0  ;;  %v110_v16 = vcombine.high %v102_v10, %v102_v10  ;;  %1204 = vmatprep.subr.msk.bf16.mxu0 %vm116_vm0, %v109_v14  ;;  %v111_v19 = vcombine.high %v109_v14, %v109_v14  ;;  %v1391_v43 = vld [vmem:[#allocation4 + $0x40] ss:$8 sps:$4 sm:$0xff]   ;;  %v1399_v44 = vld [vmem:[#allocation4 + $0x34] ss:$8 sps:$4 sm:$0xff]  }
  0x2f   :  { %144 = vmatpush1.bf16.msra.mxu0 %v118_v15  ;;  %v1394_v45 = vld [vmem:[#allocation2 + $0x30] ss:$8 sps:$4 sm:$0xff]   ;;  %v1402_v46 = vld [vmem:[#allocation2 + $0x24] ss:$8 sps:$4 sm:$0xff]   ;;  %v1400_v49 = vld [vmem:[#allocation2 + $0x20] ss:$8 sps:$4 sm:$0xff]  }
  0x30   :  { %v124_v20 = vsel %vm116_vm0, %v110_v16, 0  ;;  %1206 = vmatprep.subr.msk.bf16.mxu1 %vm116_vm0, %v111_v19  ;;  %1212 = vmatprep.subr.msk.bf16.mxu0 %vm225_vm1, %v1209_v12  ;;  %v1397_v47 = vld [vmem:[#allocation4 + $0x30] ss:$8 sps:$4 sm:$0xff]   ;;  %v1405_v48 = vld [vmem:[#allocation4 + $0x24] ss:$8 sps:$4 sm:$0xff]  }
  0x31   :  { %185 = vmatpush1.bf16.msra.mxu1 %v124_v20  ;;  %v1408_v50 = vld [vmem:[#allocation2 + $0x14] ss:$8 sps:$4 sm:$0xff]   ;;  %v1403_v51 = vld [vmem:[#allocation4 + $0x20] ss:$8 sps:$4 sm:$0xff]   ;;  %v1406_v53 = vld [vmem:[#allocation2 + $0x10] ss:$8 sps:$4 sm:$0xff]  }
  0x32   :  { %1205 = vmatmul.mubr.msk.bf16.vlgmr.msra.gmra.mxu0 %vm112_vm2, %v83_v18  ;;  %1214 = vmatprep.subr.msk.bf16.mxu1 %vm225_vm1, %v1211_v21  ;;  %v1411_v52 = vld [vmem:[#allocation4 + $0x14] ss:$8 sps:$4 sm:$0xff]   ;;  %v1414_v54 = vld [vmem:[#allocation2 + $0x4] ss:$8 sps:$4 sm:$0xff]   ;;  %v1409_v55 = vld [vmem:[#allocation4 + $0x10] ss:$8 sps:$4 sm:$0xff]  }
  0x33   :  { %253 = vmatpush1.bf16.msra.mxu0 %v227_v23  ;;  %270 = vmatprep.mubr.bf16.mxu0 %v1586_v3  ;;  %v1417_v56 = vld [vmem:[#allocation4 + $0x4] ss:$8 sps:$4 sm:$0xff]   ;;  %v1412_v57 = vld [vmem:[#allocation2] ss:$8 sps:$4 sm:$0xff]   ;;  %v1420_v59 = vld [vmem:[#allocation2 + $0xf4] ss:$8 sps:$4 sm:$0xff]  }
  0x34   :  { %1207 = vmatmul.mubr.msk.bf16.vlgmr.msra.gmra.mxu1 %vm112_vm2, %v83_v18  ;;  %558 = vmatprep.subr.bf16.mxu0 %v1372_v24  ;;  %v1415_v58 = vld [vmem:[#allocation4] ss:$8 sps:$4 sm:$0xff]   ;;  %v1418_v60 = vld [vmem:[#allocation2 + $0xf0] ss:$8 sps:$4 sm:$0xff]   ;;  %v1423_v61 = vld [vmem:[#allocation4 + $0xf4] ss:$8 sps:$4 sm:$0xff]  }
  0x35   :  { %294 = vmatpush1.bf16.msra.mxu1 %v233_v25  ;;  %311 = vmatprep.mubr.bf16.mxu1 %v1586_v3  ;;  %v1421_v62 = vld [vmem:[#allocation4 + $0xf0] ss:$8 sps:$4 sm:$0xff]   ;;  %v1426_v63 = vld [vmem:[#allocation2 + $0xe4] ss:$8 sps:$4 sm:$0xff]   ;;  %v1424_v0 = vld [vmem:[#allocation2 + $0xe0] ss:$8 sps:$4 sm:$0xff]  }
  0x36   :  { %805 = vmatprep.subr.bf16.mxu1 %v1375_v26  ;;  %v1429_v1 = vld [vmem:[#allocation4 + $0xe4] ss:$8 sps:$4 sm:$0xff]   ;;  %v1427_v2 = vld [vmem:[#allocation4 + $0xe0] ss:$8 sps:$4 sm:$0xff]   ;;  %v1432_v3 = vld [vmem:[#allocation2 + $0xd4] ss:$8 sps:$4 sm:$0xff]  }
  0x37   :  { %v1430_v5 = vld [vmem:[#allocation2 + $0xd0] ss:$8 sps:$4 sm:$0xff]   ;;  %v1435_v6 = vld [vmem:[#allocation4 + $0xd4] ss:$8 sps:$4 sm:$0xff]   ;;  %v1438_v8 = vld [vmem:[#allocation2 + $0xc4] ss:$8 sps:$4 sm:$0xff]  }
  0x38   :  { %v1433_v7 = vld [vmem:[#allocation4 + $0xd0] ss:$8 sps:$4 sm:$0xff]   ;;  %v1436_v9 = vld [vmem:[#allocation2 + $0xc0] ss:$8 sps:$4 sm:$0xff]   ;;  %v1441_v10 = vld [vmem:[#allocation4 + $0xc4] ss:$8 sps:$4 sm:$0xff]  }
  0x39   :  { %v1439_v11 = vld [vmem:[#allocation4 + $0xc0] ss:$8 sps:$4 sm:$0xff]   ;;  %v1444_v12 = vld [vmem:[#allocation2 + $0xb4] ss:$8 sps:$4 sm:$0xff]   ;;  %v1442_v13 = vld [vmem:[#allocation2 + $0xb0] ss:$8 sps:$4 sm:$0xff]  }
  0x3a   :  { %1213 = vmatmul.mubr.msk.bf16.vlgmr.msra.gmra.mxu0 %vm221_vm3, %v81_v28  ;;  %v1447_v14 = vld [vmem:[#allocation4 + $0xb4] ss:$8 sps:$4 sm:$0xff]   ;;  %v1445_v15 = vld [vmem:[#allocation4 + $0xb0] ss:$8 sps:$4 sm:$0xff]   ;;  %v1450_v16 = vld [vmem:[#allocation2 + $0xa4] ss:$8 sps:$4 sm:$0xff]  }
  0x3b   :  { %559 = vmatpush1.bf16.msra.mxu0 %v1370_v29  ;;  %v1448_v17 = vld [vmem:[#allocation2 + $0xa0] ss:$8 sps:$4 sm:$0xff]   ;;  %v1453_v18 = vld [vmem:[#allocation4 + $0xa4] ss:$8 sps:$4 sm:$0xff]   ;;  %v1456_v20 = vld [vmem:[#allocation2 + $0x94] ss:$8 sps:$4 sm:$0xff]  }
  0x3c   :  { %1215 = vmatmul.mubr.msk.bf16.vlgmr.msra.gmra.mxu1 %vm221_vm3, %v81_v28  ;;  %560 = vmatprep.subr.bf16.mxu0 %v1378_v30  ;;  %v1451_v19 = vld [vmem:[#allocation4 + $0xa0] ss:$8 sps:$4 sm:$0xff]   ;;  %v1454_v21 = vld [vmem:[#allocation2 + $0x90] ss:$8 sps:$4 sm:$0xff]   ;;  %v1459_v22 = vld [vmem:[#allocation4 + $0x94] ss:$8 sps:$4 sm:$0xff]  }
  0x3d   :  { %806 = vmatpush1.bf16.msra.mxu1 %v1373_v31  ;;  %v1457_v23 = vld [vmem:[#allocation4 + $0x90] ss:$8 sps:$4 sm:$0xff]   ;;  %v1462_v24 = vld [vmem:[#allocation2 + $0x84] ss:$8 sps:$4 sm:$0xff]   ;;  %v1460_v25 = vld [vmem:[#allocation2 + $0x80] ss:$8 sps:$4 sm:$0xff]  }
  0x3e   :  { %807 = vmatprep.subr.bf16.mxu1 %v1381_v32  ;;  %v1465_v26 = vld [vmem:[#allocation4 + $0x84] ss:$8 sps:$4 sm:$0xff]   ;;  %v1463_v27 = vld [vmem:[#allocation4 + $0x80] ss:$8 sps:$4 sm:$0xff]   ;;  %v1466_v28 = vld [vmem:[#allocation6 + $0x78] sm:$0xff]  }
  0x3f   :  { %561 = vmatpush1.bf16.msra.mxu0 %v1376_v33  ;;  %v1468_v29 = vld [vmem:[#allocation6 + $0xf8] sm:$0xff]   ;;  %v1681_v33 = vsub.s32 0, %v1656_v4 }
  0x40   :  { %562 = vmatprep.subr.bf16.mxu0 %v1384_v34 }
  0x41   :  { %808 = vmatpush1.bf16.msra.mxu1 %v1379_v35 }
  0x42   :  { %809 = vmatprep.subr.bf16.mxu1 %v1387_v37  ;;  %v1687_v37 = vsub.s32 1, %v1656_v4 }
  0x43   :  { %563 = vmatpush1.bf16.msra.mxu0 %v1382_v36  ;;  %v320_v36 = vld [vmem:[%s1714_s4] sm:$0xf] }
  0x44   :  { %564 = vmatprep.subr.bf16.mxu0 %v1390_v39 }
  0x45   :  { %810 = vmatpush1.bf16.msra.mxu1 %v1385_v38  ;;  %v332_v38 = vsub.s32 2, %v1656_v4 }
  0x46   :  { %811 = vmatprep.subr.bf16.mxu1 %v1393_v40 }
  0x47   :  { %565 = vmatpush1.bf16.msra.mxu0 %v1388_v41  ;;  %v325_v41 = vrot.slane %v320_v36, %v1681_v33 }
  0x48   :  { %566 = vmatprep.subr.bf16.mxu0 %v1396_v42  ;;  %v336_v42 = vsub.s32 3, %v1656_v4 }
  0x49   :  { %812 = vmatpush1.bf16.msra.mxu1 %v1391_v43 }
  0x4a   :  { %813 = vmatprep.subr.bf16.mxu1 %v1399_v44 }
  0x4b   :  { %567 = vmatpush1.bf16.msra.mxu0 %v1394_v45 }
  0x4c   :  { %568 = vmatprep.subr.bf16.mxu0 %v1402_v46  ;;  %v329_v46 = vrot.slane %v320_v36, %v1687_v37 }
  0x4d   :  { %814 = vmatpush1.bf16.msra.mxu1 %v1397_v47  ;;  %v333_v47 = vrot.slane %v320_v36, %v332_v38  ;;  %v1497_v38 = vld [vmem:[#allocation6 + $0x80] sm:$0xff]  }
  0x4e   :  { %815 = vmatprep.subr.bf16.mxu1 %v1405_v48 }
  0x4f   :  { %569 = vmatpush1.bf16.msra.mxu0 %v1400_v49 }
  0x50   :  { %570 = vmatprep.subr.bf16.mxu0 %v1408_v50 }
  0x51   :  { %816 = vmatpush1.bf16.msra.mxu1 %v1403_v51 }
  0x52   :  { %817 = vmatprep.subr.bf16.mxu1 %v1411_v52 }
  0x53   :  { %571 = vmatpush1.bf16.msra.mxu0 %v1406_v53  ;;  %v337_v53 = vrot.slane %v320_v36, %v336_v42  ;;  %v1496_v36 = vld [vmem:[#allocation6 + $0xc0] sm:$0xff]  }
  0x54   :  { %572 = vmatprep.subr.bf16.mxu0 %v1414_v54 }
  0x55   :  { %818 = vmatpush1.bf16.msra.mxu1 %v1409_v55 }
  0x56   :  { %819 = vmatprep.subr.bf16.mxu1 %v1417_v56 }
  0x57   :  { %573 = vmatpush1.bf16.msra.mxu0 %v1412_v57 }
  0x58   :  { %574 = vmatprep.subr.bf16.mxu0 %v1420_v59 }
  0x59   :  { %820 = vmatpush1.bf16.msra.mxu1 %v1415_v58 }
  0x5a   :  { %821 = vmatprep.subr.bf16.mxu1 %v1423_v61 }
  0x5b   :  { %575 = vmatpush2.bf16.msra.mxu0 %v1418_v60 }
  0x5c   :  { %576 = vmatprep.subr.bf16.mxu0 %v1426_v63 }
  0x5d   :  { %822 = vmatpush2.bf16.msra.mxu1 %v1421_v62 }
  0x5e   :  { %823 = vmatprep.subr.bf16.mxu1 %v1429_v1 }
  0x5f   :  { %577 = vmatpush2.bf16.msra.mxu0 %v1424_v0 }
  0x60   :  { %578 = vmatprep.subr.bf16.mxu0 %v1432_v3 }
  0x61   :  { %824 = vmatpush2.bf16.msra.mxu1 %v1427_v2  ;;  %v1467_v2 = vld [vmem:[#allocation6 + $0x38] sm:$0xff]  }
  0x62   :  { %825 = vmatprep.subr.bf16.mxu1 %v1435_v6  ;;  %v1470_v6 = vld [vmem:[#allocation6 + $0x70] sm:$0xff]  }
  0x63   :  { %579 = vmatpush2.bf16.msra.mxu0 %v1430_v5 }
  0x64   :  { %580 = vmatprep.subr.bf16.mxu0 %v1438_v8  ;;  %v1469_v8 = vld [vmem:[#allocation6 + $0xb8] sm:$0xff]  }
  0x65   :  { %826 = vmatpush2.bf16.msra.mxu1 %v1433_v7 }
  0x66   :  { %827 = vmatprep.subr.bf16.mxu1 %v1441_v10  ;;  %v1472_v10 = vld [vmem:[#allocation6 + $0xf0] sm:$0xff]  }
  0x67   :  { %581 = vmatpush2.bf16.msra.mxu0 %v1436_v9 }
  0x68   :  { %582 = vmatprep.subr.bf16.mxu0 %v1444_v12  ;;  %v1474_v12 = vld [vmem:[#allocation6 + $0x68] sm:$0xff]  }
  0x69   :  { %828 = vmatpush2.bf16.msra.mxu1 %v1439_v11  ;;  %v1471_v11 = vld [vmem:[#allocation6 + $0x30] sm:$0xff]  }
  0x6a   :  { %829 = vmatprep.subr.bf16.mxu1 %v1447_v14  ;;  %v1475_v14 = vld [vmem:[#allocation6 + $0x28] sm:$0xff]  }
  0x6b   :  { %583 = vmatpush2.bf16.msra.mxu0 %v1442_v13  ;;  %v1473_v13 = vld [vmem:[#allocation6 + $0xb0] sm:$0xff]  }
  0x6c   :  { %584 = vmatprep.subr.bf16.mxu0 %v1450_v16  ;;  %v1477_v16 = vld [vmem:[#allocation6 + $0xa8] sm:$0xff]  }
  0x6d   :  { %830 = vmatpush2.bf16.msra.mxu1 %v1445_v15  ;;  %v1476_v15 = vld [vmem:[#allocation6 + $0xe8] sm:$0xff]  }
  0x6e   :  { %831 = vmatprep.subr.bf16.mxu1 %v1453_v18  ;;  %v1479_v18 = vld [vmem:[#allocation6 + $0x20] sm:$0xff]  }
  0x6f   :  { %585 = vmatpush2.bf16.msra.mxu0 %v1448_v17  ;;  %v1478_v17 = vld [vmem:[#allocation6 + $0x60] sm:$0xff]  }
  0x70   :  { %586 = vmatprep.subr.bf16.mxu0 %v1456_v20  ;;  %v1481_v20 = vld [vmem:[#allocation6 + $0xa0] sm:$0xff]  }
  0x71   :  { %832 = vmatpush2.bf16.msra.mxu1 %v1451_v19  ;;  %v1480_v19 = vld [vmem:[#allocation6 + $0xe0] sm:$0xff]  }
  0x72   :  { %833 = vmatprep.subr.bf16.mxu1 %v1459_v22  ;;  %v1483_v22 = vld [vmem:[#allocation6 + $0x18] sm:$0xff]  }
  0x73   :  { %587 = vmatpush2.bf16.msra.mxu0 %v1454_v21  ;;  %v1482_v21 = vld [vmem:[#allocation6 + $0x58] sm:$0xff]  }
  0x74   :  { %588 = vmatprep.subr.bf16.mxu0 %v1462_v24  ;;  %v1485_v24 = vld [vmem:[#allocation6 + $0x98] sm:$0xff]  }
  0x75   :  { %834 = vmatpush2.bf16.msra.mxu1 %v1457_v23  ;;  %v1484_v23 = vld [vmem:[#allocation6 + $0xd8] sm:$0xff]  }
  0x76   :  { %835 = vmatprep.subr.bf16.mxu1 %v1465_v26  ;;  %v1487_v26 = vld [vmem:[#allocation6 + $0x10] sm:$0xff]  }
  0x77   :  { %589 = vmatpush2.bf16.msra.mxu0 %v1460_v25  ;;  %v1486_v25 = vld [vmem:[#allocation6 + $0x50] sm:$0xff]  }
  0x78   :  { %1313 = vmatprep.subr.bf16.mxu0 %v1466_v28  ;;  %v1489_v28 = vld [vmem:[#allocation6 + $0x90] sm:$0xff]  }
  0x79   :  { %836 = vmatpush2.bf16.msra.mxu1 %v1463_v27  ;;  %v1488_v27 = vld [vmem:[#allocation6 + $0xd0] sm:$0xff]  }
  0x7a   :  { %1335 = vmatprep.subr.bf16.mxu1 %v1468_v29  ;;  %v1490_v29 = vld [vmem:[#allocation6 + $0x48] sm:$0xff]  }
  0xf2   :  { %v163_v30 = vpop.f32.mrf.mxu0 }
  0xf4   :  { %v165_v31 = vpop.f32.mrf.mxu0  ;;  %v204_v32 = vpop.f32.mrf.mxu1 }
  0xf6   :  { %v167_v34 = vpop.f32.mrf.mxu0  ;;  %v206_v35 = vpop.f32.mrf.mxu1 }
  0xf7   :  { %v1494_v34 = vld [vmem:[#allocation6 + $0x40] sm:$0xff]  }
  0xf8   :  { %v168_v39 = vpop.f32.mrf.mxu0  ;;  %v208_v40 = vpop.f32.mrf.mxu1 }
  0xf9   :  { %v386_v39 = vld [vmem:[%s1716_s6] sm:$0x3] }
  0xfa   :  { %v209_v43 = vpop.f32.mrf.mxu1  ;;  %v272_v44 = vpop.f32.mrf.mxu0  ;;  %v633_v40 = vld [vmem:[%s1718_s8] sm:$0x3]  ;;  %v395_v42 = vrot.slane %v386_v39, %v1687_v37 }
  0xfb   :  { %v273_v45 = vadd.f32 %v272_v44, %v163_v30  ;;  %v1491_v30 = vld [vmem:[#allocation6 + $0x8] sm:$0xff]   ;;  %v638_v43 = vrot.slane %v633_v40, %v1681_v33 }
  0xfc   :  { %v274_v48 = vpop.f32.mrf.mxu0  ;;  %v313_v49 = vpop.f32.mrf.mxu1 }
  0xfd   :  { %v342_v50 = vadd.f32 %v325_v41, %v273_v45  ;;  %v275_v51 = vadd.f32 %v274_v48, %v165_v31  ;;  %v314_v52 = vadd.f32 %v313_v49, %v204_v32  ;;  %v1492_v31 = vld [vmem:[#allocation6 + $0xc8] sm:$0xff]   ;;  %v391_v41 = vrot.slane %v386_v39, %v1681_v33 }
  0xfe   :  { %v276_v54 = vpop.f32.mrf.mxu0  ;;  %v315_v55 = vpop.f32.mrf.mxu1  ;;  %v1493_v32 = vld [vmem:[#allocation6 + $0x88] sm:$0xff]  }
  0xff   :  { %v343_v56 = vadd.f32 %v329_v46, %v275_v51  ;;  %v344_v57 = vadd.f32 %v333_v47, %v314_v52  ;;  %v316_v58 = vadd.f32 %v315_v55, %v206_v35  ;;  %1498 = vtanh.f32 %v342_v50  ;;  %v1495_v35 = vld [vmem:[#allocation6] sm:$0xff]  }
 0x100   :  { %v277_v59 = vpop.f32.mrf.mxu0  ;;  %v317_v4 = vpop.f32.mrf.mxu1  ;;  %v642_v46 = vrot.slane %v633_v40, %v1687_v37 }
 0x101   :  { %1500 = vtanh.f32 %v343_v56  ;;  %v345_v60 = vadd.f32 %v337_v53, %v316_v58 }
 0x102   :  { %1502 = vtanh.f32 %v344_v57  ;;  %v318_v61 = vpop.f32.mrf.mxu1 }
 0x103   :  { %1504 = vtanh.f32 %v345_v60 }
 0x10c   :  { %v1499_v62 = vpop.eup %1498 }
 0x10d   :  { %v350_v5 = vpack.c.bf16 %v1499_v62, %v1499_v62 }
 0x10e   :  { %v1501_v63 = vpop.eup %1500 }
 0x10f   :  { %v1503_v0 = vpop.eup %1502  ;;  %v351_v1 = vpack.c.bf16 %v1501_v63, %v1501_v63 }
 0x110   :  { %v1505_v3 = vpop.eup %1504  ;;  %v352_v9 = vpack.c.bf16 %v1503_v0, %v1503_v0 }
 0x111   :  { %590 = vmatprep.mubr.bf16.mxu0 %v351_v1  ;;  %v353_v7 = vpack.c.bf16 %v1505_v3, %v1505_v3 }
 0x112   :  { %591 = vmatmul.mubr.bf16.vlgmr.msra.gmra.mxu0 %v350_v5 }
 0x113   :  { %837 = vmatprep.mubr.bf16.mxu1 %v353_v7  ;;  %1314 = vmatpush3.bf16.msra.mxu0 %v1467_v2 }
 0x114   :  { %838 = vmatmul.mubr.bf16.vlgmr.msra.gmra.mxu1 %v352_v9  ;;  %1315 = vmatprep.subr.bf16.mxu0 %v1470_v6  ;;  %v1312_v6 = vld [vmem:[%s1720_s10] ss:$0 sm:$0xff] }
 0x115   :  { %1336 = vmatpush3.bf16.msra.mxu1 %v1469_v8 }
 0x116   :  { %1337 = vmatprep.subr.bf16.mxu1 %v1472_v10 }
 0x117   :  { %1316 = vmatpush3.bf16.msra.mxu0 %v1471_v11 }
 0x118   :  { %1317 = vmatprep.subr.bf16.mxu0 %v1474_v12 }
 0x119   :  { %1338 = vmatpush3.bf16.msra.mxu1 %v1473_v13 }
 0x11a   :  { %1339 = vmatprep.subr.bf16.mxu1 %v1476_v15 }
 0x11b   :  { %1318 = vmatpush3.bf16.msra.mxu0 %v1475_v14 }
 0x11c   :  { %1319 = vmatprep.subr.bf16.mxu0 %v1478_v17 }
 0x11d   :  { %1340 = vmatpush3.bf16.msra.mxu1 %v1477_v16 }
 0x11e   :  { %1341 = vmatprep.subr.bf16.mxu1 %v1480_v19 }
 0x11f   :  { %1320 = vmatpush3.bf16.msra.mxu0 %v1479_v18 }
 0x120   :  { %1321 = vmatprep.subr.bf16.mxu0 %v1482_v21 }
 0x121   :  { %1342 = vmatpush3.bf16.msra.mxu1 %v1481_v20 }
 0x122   :  { %1343 = vmatprep.subr.bf16.mxu1 %v1484_v23 }
 0x123   :  { %1322 = vmatpush3.bf16.msra.mxu0 %v1483_v22 }
 0x124   :  { %1323 = vmatprep.subr.bf16.mxu0 %v1486_v25 }
 0x125   :  { %1344 = vmatpush3.bf16.msra.mxu1 %v1485_v24 }
 0x126   :  { %1345 = vmatprep.subr.bf16.mxu1 %v1488_v27 }
 0x127   :  { %1324 = vmatpush3.bf16.msra.mxu0 %v1487_v26 }
 0x128   :  { %1325 = vmatprep.subr.bf16.mxu0 %v1490_v29 }
 0x129   :  { %1346 = vmatpush3.bf16.msra.mxu1 %v1489_v28 }
 0x12a   :  { %1347 = vmatprep.subr.bf16.mxu1 %v1492_v31 }
 0x12b   :  { %1326 = vmatpush3.bf16.msra.mxu0 %v1491_v30 }
 0x12c   :  { %1327 = vmatprep.subr.bf16.mxu0 %v1494_v34 }
 0x12d   :  { %1348 = vmatpush3.bf16.msra.mxu1 %v1493_v32 }
 0x12e   :  { %1349 = vmatprep.subr.bf16.mxu1 %v1496_v36 }
 0x12f   :  { %1328 = vmatpush3.bf16.msra.mxu0 %v1495_v35 }
 0x131   :  { %1350 = vmatpush3.bf16.msra.mxu1 %v1497_v38 }
 0x1d2   :  { %v592_v44 = vpop.f32.mrf.mxu0 }
 0x1d3   :  { %v593_v45 = vadd.f32 %v592_v44, %v391_v41 }
 0x1d4   :  { %v594_v47 = vpop.f32.mrf.mxu0  ;;  %v839_v48 = vpop.f32.mrf.mxu1 }
 0x1d5   :  { %v595_v49 = vadd.f32 %v594_v47, %v395_v42  ;;  %v840_v50 = vadd.f32 %v839_v48, %v638_v43  ;;  %1506 = vtanh.f32 %v593_v45 }
 0x1d6   :  { %v596_v51 = vpop.f32.mrf.mxu0  ;;  %v841_v52 = vpop.f32.mrf.mxu1 }
 0x1d7   :  { %1508 = vtanh.f32 %v595_v49  ;;  %v842_v53 = vadd.f32 %v841_v52, %v642_v46 }
 0x1d8   :  { %1510 = vtanh.f32 %v840_v50  ;;  %v597_v54 = vpop.f32.mrf.mxu0  ;;  %v843_v55 = vpop.f32.mrf.mxu1 }
 0x1d9   :  { %1512 = vtanh.f32 %v842_v53 }
 0x1da   :  { %v844_v56 = vpop.f32.mrf.mxu1 }
 0x1e2   :  { %v1507_v57 = vpop.eup %1506 }
 0x1e3   :  { %v848_v37 = vpack.c.bf16 %v1507_v57, %v1507_v57 }
 0x1e4   :  { %v1509_v33 = vpop.eup %1508 }
 0x1e5   :  { %v1511_v58 = vpop.eup %1510  ;;  %v849_v59 = vpack.c.bf16 %v1509_v33, %v1509_v33 }
 0x1e6   :  { %v1513_v4 = vpop.eup %1512  ;;  %v850_v61 = vpack.c.bf16 %v1511_v58, %v1511_v58 }
 0x1e7   :  { %1140 = vmatprep.mubr.bf16.mxu0 %v849_v59  ;;  %v851_v60 = vpack.c.bf16 %v1513_v4, %v1513_v4 }
 0x1e8   :  { %1141 = vmatmul.mubr.bf16.vlgmr.msra.gmra.mxu0 %v848_v37 }
 0x1e9   :  { %1180 = vmatprep.mubr.bf16.mxu1 %v851_v60 }
 0x1ea   :  { %1181 = vmatmul.mubr.bf16.vlgmr.msra.gmra.mxu1 %v850_v61 }
 0x2a8   :  { %v1329_v62 = vpop.f32.mrf.mxu0 }
 0x2aa   :  { %v1330_v63 = vpop.f32.mrf.mxu0  ;;  %v1351_v0 = vpop.f32.mrf.mxu1 }
 0x2ab   :  { %v1331_v3 = vadd.f32 %v1330_v63, %v1329_v62 }
 0x2ac   :  { %v1332_v1 = vpop.f32.mrf.mxu0  ;;  %v1352_v2 = vpop.f32.mrf.mxu1 }
 0x2ad   :  { %v1353_v5 = vadd.f32 %v1352_v2, %v1351_v0 }
 0x2ae   :  { %v1333_v7 = vpop.f32.mrf.mxu0  ;;  %v1354_v8 = vpop.f32.mrf.mxu1 }
 0x2af   :  { %v1183_v9 = vadd.f32 %v1353_v5, %v1331_v3 }
 0x2b0   :  { %v1355_v10 = vpop.f32.mrf.mxu1 }
 0x2b1   :  { %v1195_v11 = vadd.f32 %v1312_v6, %v1183_v9 }
 0x2b3   :  { %1196 = vst.msk [vmem:[%s1721_s11] sm:$0xff] %vm112_vm2, %v1195_v11 }
 0x2b4   :  { %1201 = vsyncpa [#allocation3], 1 }
 0x2b5   :  { %1202 = vsyncpa [#allocation5], 1 }

</bundles_post_ra>
